<compile_context>
chip_gen: v7x
topology: tpu7x:2x2x1
jax: 0.10.0
libtpu: 0.0.40
codegen_flags: <defaults>
</compile_context>

<pallas_src>
import math

import jax
import jax.numpy as jnp
from jax.experimental import pallas as pl
from jax.experimental.pallas import tpu as pltpu


def _round_up(x, m):
    return ((x + m - 1) // m) * m


def _mask_linear_kernel(idx_ref, xv_ref, w_ref, b_ref, o_ref):
    # idx_ref : VMEM (Kpad, TB)  int32 -- scatter indices; rows = j, lanes = batch
    # xv_ref  : VMEM (Kpad, TB)  f32   -- x.squeeze() values, same layout
    # w_ref   : VMEM (Npad, 1)   f32   -- weight as a column (lane-broadcast)
    # b_ref   : SMEM (1,)        f32   -- scalar bias (0 when handled outside)
    # o_ref   : VMEM (1, TB)     f32   -- lane-dense per-row results
    kpad, tb = idx_ref.shape
    npad = w_ref.shape[0]

    # Feature index along sublanes, batch along lanes.
    n_iota = jax.lax.broadcasted_iota(jnp.int32, (npad, tb), 0)

    # Build the masked matrix mask[idx] = x with ordered selects.
    # Later j overwrites earlier j -> torch's last-write-wins for duplicates.
    # Padded entries carry idx == Npad and never match the iota.
    mt = jnp.zeros((npad, tb), jnp.float32)
    for j in range(kpad):  # K is static & tiny -> full unroll
        ij = idx_ref[j:j + 1, :]          # (1, TB), sublane-broadcast
        vj = xv_ref[j:j + 1, :]           # (1, TB)
        mt = jnp.where(n_iota == ij, vj, mt)

    # weight @ mask per batch lane: VPU multiply + sublane reduce (XLU).
    prod = mt * w_ref[...]                            # (Npad, TB)
    acc = jnp.sum(prod, axis=0, keepdims=True)        # (1, TB), lane-dense

    # Single unmasked lane-dense store (+ scalar bias from SMEM).
    o_ref[...] = acc + b_ref[0]


def mask_linear_batched(x, idx, weight, bias=None, *, lane_tile=128):
    """Batched MaskLinear: many independent (x, idx) pairs, shared weight/bias.

    x      : (B, K) or (B, K, 1) values
    idx    : (B, K) int indices into the feature axis
    weight : (in_features,)
    bias   : (out_features,) or None
    returns: (B, out_features) if bias is not None, else (B,) scalars
    """
    idx = jnp.asarray(idx, jnp.int32)
    B, K = idx.shape
    xv = jnp.asarray(x, jnp.float32).reshape(B, K)
    w = jnp.asarray(weight, jnp.float32)
    assert w.ndim == 1, "MaskLinear weight must be a 1-D (in_features,) vector"
    in_features = w.shape[0]

    npad = _round_up(in_features, 8)
    kpad = _round_up(K, 8)
    bpad = _round_up(B, lane_tile)

    # (K, B) layouts: j on sublanes, batch on lanes.  Padded idx entries get
    # the sentinel `npad`, which never matches the feature iota.
    idx_t = jnp.full((kpad, bpad), npad, jnp.int32).at[:K, :B].set(idx.T)
    xv_t = jnp.zeros((kpad, bpad), jnp.float32).at[:K, :B].set(xv.T)
    w_col = jnp.zeros((npad, 1), jnp.float32).at[:in_features, 0].set(w)

    bias_arr = None
    if bias is not None:
        bias_arr = jnp.asarray(bias, jnp.float32).reshape(-1)
    fold_bias = bias_arr is not None and bias_arr.shape[0] == 1
    b_smem = bias_arr if fold_bias else jnp.zeros((1,), jnp.float32)

    num_tiles = bpad // lane_tile
    acc = pl.pallas_call(
        _mask_linear_kernel,
        out_shape=jax.ShapeDtypeStruct((1, bpad), jnp.float32),
        grid=(num_tiles,),
        in_specs=[
            pl.BlockSpec((kpad, lane_tile), lambda bt: (0, bt)),   # idx  (VMEM)
            pl.BlockSpec((kpad, lane_tile), lambda bt: (0, bt)),   # xval (VMEM)
            pl.BlockSpec((npad, 1), lambda bt: (0, 0)),            # weight col
            pl.BlockSpec(memory_space=pltpu.MemorySpace.SMEM),     # bias scalar
        ],
        out_specs=pl.BlockSpec((1, lane_tile), lambda bt: (0, bt)),
        compiler_params=pltpu.CompilerParams(
            dimension_semantics=("parallel",)),
    )(idx_t, xv_t, w_col, b_smem)

    acc = acc[0, :B]                       # (B,) per-row weight@mask (+ bias if folded)
    if bias_arr is None:
        return acc                         # scalar per call, like torch with bias=None
    if fold_bias:
        return acc.reshape(B, 1)           # bias already added in-kernel
    return acc[:, None] + bias_arr[None, :]  # out_features > 1: broadcast like torch


def mask_linear(x, idx, weight, bias=None):
    """Single-call forward, matching the PyTorch module exactly."""
    idx1 = jnp.asarray(idx, jnp.int32).reshape(1, -1)
    xv1 = jnp.asarray(x, jnp.float32).reshape(1, -1)
    out = mask_linear_batched(xv1, idx1, weight, bias)
    return out[0]   # scalar if bias is None, else (out_features,)


if __name__ == "__main__":
    in_features = 256
    out_features = 1
    K = 8
    B = 4

    key = jax.random.PRNGKey(0)
    kw, kb, kx, ki = jax.random.split(key, 4)

    stdv = 1.0 / math.sqrt(in_features)
    weight = jax.random.uniform(kw, (in_features,), jnp.float32, -stdv, stdv)
    bias = jax.random.uniform(kb, (out_features,), jnp.float32, -stdv, stdv)

    # ---- single call (exactly the PyTorch forward) ----
    x = jax.random.normal(kx, (K, 1), jnp.float32)   # as it comes from the GCN layer
    idx = jax.random.choice(ki, in_features, shape=(K,), replace=False).astype(jnp.int32)

    result = mask_linear(x, idx, weight, bias)
    jax.block_until_ready(result)

    mask_ref = jnp.zeros((in_features,), jnp.float32).at[idx].set(jnp.squeeze(x))
    ref = jnp.dot(weight, mask_ref) + bias
    assert jnp.allclose(result, ref, atol=1e-5), (result, ref)

    # ---- bias=None path: torch returns the bare scalar ----
    res_nb = mask_linear(x, idx, weight, None)
    jax.block_until_ready(res_nb)
    assert jnp.allclose(res_nb, jnp.dot(weight, mask_ref), atol=1e-5), res_nb

    # ---- batched calls: all rows handled in a single grid step ----
    kxb, kib = jax.random.split(jax.random.PRNGKey(1))
    xb = jax.random.normal(kxb, (B, K), jnp.float32)
    idx_rows = []
    for r in range(B):
        idx_rows.append(
            jax.random.choice(jax.random.fold_in(kib, r), in_features,
                              shape=(K,), replace=False))
    idxb = jnp.stack(idx_rows).astype(jnp.int32)

    outb = mask_linear_batched(xb, idxb, weight, bias)
    jax.block_until_ready(outb)

    refb = []
    for r in range(B):
        m = jnp.zeros((in_features,), jnp.float32).at[idxb[r]].set(xb[r])
        refb.append(jnp.dot(weight, m) + bias)
    refb = jnp.stack(refb)
    assert jnp.allclose(outb, refb, atol=1e-5), (outb, refb)

    # ---- duplicate-index check: last write wins, like torch's mask[idx] = x ----
    idx_dup = jnp.array([3, 7, 3, 10, 20, 7, 42, 3], jnp.int32)
    x_dup = jax.random.normal(jax.random.PRNGKey(2), (K,), jnp.float32)
    res_dup = mask_linear(x_dup, idx_dup, weight, bias)
    jax.block_until_ready(res_dup)
    m = jnp.zeros((in_features,), jnp.float32)
    for j in range(K):                       # sequential writes -> last write wins
        m = m.at[idx_dup[j]].set(x_dup[j])
    ref_dup = jnp.dot(weight, m) + bias
    assert jnp.allclose(res_dup, ref_dup, atol=1e-5), (res_dup, ref_dup)

    print("KERNEL_OK")
</pallas_src>

<mosaic_0001>
module attributes {stable_mosaic.version = 11 : i64} {
  func.func @_mask_linear_kernel(%arg0: i32, %arg1: memref<8x128xi32, #tpu.memory_space<vmem>>, %arg2: memref<8x128xf32, #tpu.memory_space<vmem>>, %arg3: memref<256x1xf32, #tpu.memory_space<vmem>>, %arg4: memref<1xf32, #tpu.memory_space<smem>>, %arg5: memref<1x128xf32, #tpu.memory_space<vmem>>) attributes {dimension_semantics = [#tpu.dimension_semantics<parallel>], iteration_bounds = array<i64: 1>, scalar_prefetch = 0 : i64, scratch_operands = 0 : i64, tpu.core_type = #tpu.core_type<tc>, window_params = [{transform_indices = @transform_0, window_bounds = array<i64: 8, 128>}, {transform_indices = @transform_1, window_bounds = array<i64: 8, 128>}, {pipeline_mode = #tpu.pipeline_mode<synchronous>, transform_indices = @transform_2, window_bounds = array<i64: 256, 1>}, {transform_indices = @transform_3, window_bounds = array<i64: 1>}, {transform_indices = @transform_4, window_bounds = array<i64: 1, 128>}]} {
    %0 = tpu.iota {dimensions = array<i32: 0>} : vector<256x128xi32>
    %cst = arith.constant 0.000000e+00 : f32
    %1 = vector.broadcast %cst : f32 to vector<256x128xf32>
    %c0 = arith.constant 0 : index
    %c0_0 = arith.constant 0 : index
    %2 = vector.load %arg1[%c0, %c0_0] : memref<8x128xi32, #tpu.memory_space<vmem>>, vector<1x128xi32>
    %c0_1 = arith.constant 0 : index
    %c0_2 = arith.constant 0 : index
    %3 = vector.load %arg2[%c0_1, %c0_2] : memref<8x128xf32, #tpu.memory_space<vmem>>, vector<1x128xf32>
    %4 = vector.broadcast %2 : vector<1x128xi32> to vector<256x128xi32>
    %5 = arith.cmpi eq, %0, %4 : vector<256x128xi32>
    %6 = vector.shape_cast %3 : vector<1x128xf32> to vector<1x128xf32>
    %7 = vector.broadcast %6 : vector<1x128xf32> to vector<256x128xf32>
    %8 = arith.select %5, %7, %1 : vector<256x128xi1>, vector<256x128xf32>
    %c1 = arith.constant 1 : index
    %c0_3 = arith.constant 0 : index
    %9 = vector.load %arg1[%c1, %c0_3] : memref<8x128xi32, #tpu.memory_space<vmem>>, vector<1x128xi32>
    %c1_4 = arith.constant 1 : index
    %c0_5 = arith.constant 0 : index
    %10 = vector.load %arg2[%c1_4, %c0_5] : memref<8x128xf32, #tpu.memory_space<vmem>>, vector<1x128xf32>
    %11 = vector.broadcast %9 : vector<1x128xi32> to vector<256x128xi32>
    %12 = arith.cmpi eq, %0, %11 : vector<256x128xi32>
    %13 = vector.shape_cast %10 : vector<1x128xf32> to vector<1x128xf32>
    %14 = vector.broadcast %13 : vector<1x128xf32> to vector<256x128xf32>
    %15 = arith.select %12, %14, %8 : vector<256x128xi1>, vector<256x128xf32>
    %c2 = arith.constant 2 : index
    %c0_6 = arith.constant 0 : index
    %16 = vector.load %arg1[%c2, %c0_6] : memref<8x128xi32, #tpu.memory_space<vmem>>, vector<1x128xi32>
    %c2_7 = arith.constant 2 : index
    %c0_8 = arith.constant 0 : index
    %17 = vector.load %arg2[%c2_7, %c0_8] : memref<8x128xf32, #tpu.memory_space<vmem>>, vector<1x128xf32>
    %18 = vector.broadcast %16 : vector<1x128xi32> to vector<256x128xi32>
    %19 = arith.cmpi eq, %0, %18 : vector<256x128xi32>
    %20 = vector.shape_cast %17 : vector<1x128xf32> to vector<1x128xf32>
    %21 = vector.broadcast %20 : vector<1x128xf32> to vector<256x128xf32>
    %22 = arith.select %19, %21, %15 : vector<256x128xi1>, vector<256x128xf32>
    %c3 = arith.constant 3 : index
    %c0_9 = arith.constant 0 : index
    %23 = vector.load %arg1[%c3, %c0_9] : memref<8x128xi32, #tpu.memory_space<vmem>>, vector<1x128xi32>
    %c3_10 = arith.constant 3 : index
    %c0_11 = arith.constant 0 : index
    %24 = vector.load %arg2[%c3_10, %c0_11] : memref<8x128xf32, #tpu.memory_space<vmem>>, vector<1x128xf32>
    %25 = vector.broadcast %23 : vector<1x128xi32> to vector<256x128xi32>
    %26 = arith.cmpi eq, %0, %25 : vector<256x128xi32>
    %27 = vector.shape_cast %24 : vector<1x128xf32> to vector<1x128xf32>
    %28 = vector.broadcast %27 : vector<1x128xf32> to vector<256x128xf32>
    %29 = arith.select %26, %28, %22 : vector<256x128xi1>, vector<256x128xf32>
    %c4 = arith.constant 4 : index
    %c0_12 = arith.constant 0 : index
    %30 = vector.load %arg1[%c4, %c0_12] : memref<8x128xi32, #tpu.memory_space<vmem>>, vector<1x128xi32>
    %c4_13 = arith.constant 4 : index
    %c0_14 = arith.constant 0 : index
    %31 = vector.load %arg2[%c4_13, %c0_14] : memref<8x128xf32, #tpu.memory_space<vmem>>, vector<1x128xf32>
    %32 = vector.broadcast %30 : vector<1x128xi32> to vector<256x128xi32>
    %33 = arith.cmpi eq, %0, %32 : vector<256x128xi32>
    %34 = vector.shape_cast %31 : vector<1x128xf32> to vector<1x128xf32>
    %35 = vector.broadcast %34 : vector<1x128xf32> to vector<256x128xf32>
    %36 = arith.select %33, %35, %29 : vector<256x128xi1>, vector<256x128xf32>
    %c5 = arith.constant 5 : index
    %c0_15 = arith.constant 0 : index
    %37 = vector.load %arg1[%c5, %c0_15] : memref<8x128xi32, #tpu.memory_space<vmem>>, vector<1x128xi32>
    %c5_16 = arith.constant 5 : index
    %c0_17 = arith.constant 0 : index
    %38 = vector.load %arg2[%c5_16, %c0_17] : memref<8x128xf32, #tpu.memory_space<vmem>>, vector<1x128xf32>
    %39 = vector.broadcast %37 : vector<1x128xi32> to vector<256x128xi32>
    %40 = arith.cmpi eq, %0, %39 : vector<256x128xi32>
    %41 = vector.shape_cast %38 : vector<1x128xf32> to vector<1x128xf32>
    %42 = vector.broadcast %41 : vector<1x128xf32> to vector<256x128xf32>
    %43 = arith.select %40, %42, %36 : vector<256x128xi1>, vector<256x128xf32>
    %c6 = arith.constant 6 : index
    %c0_18 = arith.constant 0 : index
    %44 = vector.load %arg1[%c6, %c0_18] : memref<8x128xi32, #tpu.memory_space<vmem>>, vector<1x128xi32>
    %c6_19 = arith.constant 6 : index
    %c0_20 = arith.constant 0 : index
    %45 = vector.load %arg2[%c6_19, %c0_20] : memref<8x128xf32, #tpu.memory_space<vmem>>, vector<1x128xf32>
    %46 = vector.broadcast %44 : vector<1x128xi32> to vector<256x128xi32>
    %47 = arith.cmpi eq, %0, %46 : vector<256x128xi32>
    %48 = vector.shape_cast %45 : vector<1x128xf32> to vector<1x128xf32>
    %49 = vector.broadcast %48 : vector<1x128xf32> to vector<256x128xf32>
    %50 = arith.select %47, %49, %43 : vector<256x128xi1>, vector<256x128xf32>
    %c7 = arith.constant 7 : index
    %c0_21 = arith.constant 0 : index
    %51 = vector.load %arg1[%c7, %c0_21] : memref<8x128xi32, #tpu.memory_space<vmem>>, vector<1x128xi32>
    %c7_22 = arith.constant 7 : index
    %c0_23 = arith.constant 0 : index
    %52 = vector.load %arg2[%c7_22, %c0_23] : memref<8x128xf32, #tpu.memory_space<vmem>>, vector<1x128xf32>
    %53 = vector.broadcast %51 : vector<1x128xi32> to vector<256x128xi32>
    %54 = arith.cmpi eq, %0, %53 : vector<256x128xi32>
    %55 = vector.shape_cast %52 : vector<1x128xf32> to vector<1x128xf32>
    %56 = vector.broadcast %55 : vector<1x128xf32> to vector<256x128xf32>
    %57 = arith.select %54, %56, %50 : vector<256x128xi1>, vector<256x128xf32>
    %c0_24 = arith.constant 0 : index
    %c0_25 = arith.constant 0 : index
    %58 = vector.load %arg3[%c0_24, %c0_25] : memref<256x1xf32, #tpu.memory_space<vmem>>, vector<256x1xf32>
    %59 = vector.broadcast %58 : vector<256x1xf32> to vector<256x128xf32>
    %60 = arith.mulf %57, %59 : vector<256x128xf32>
    %cst_26 = arith.constant dense<0.000000e+00> : vector<128xf32>
    %61 = vector.multi_reduction <add>, %60, %cst_26 [0] : vector<256x128xf32> to vector<128xf32>
    %62 = vector.shape_cast %61 : vector<128xf32> to vector<1x128xf32>
    %c0_27 = arith.constant 0 : index
    %63 = memref.load %arg4[%c0_27] : memref<1xf32, #tpu.memory_space<smem>>
    %64 = vector.broadcast %63 : f32 to vector<1x128xf32>
    %65 = arith.addf %62, %64 : vector<1x128xf32>
    %c0_28 = arith.constant 0 : index
    %c0_29 = arith.constant 0 : index
    %66 = vector.load %arg5[%c0_28, %c0_29] : memref<1x128xf32, #tpu.memory_space<vmem>>, vector<1x128xf32>
    tpu.vector_store %arg5[%c0_28, %c0_29], %65 {strides = array<i32>} : memref<1x128xf32, #tpu.memory_space<vmem>>, vector<1x128xf32>,
    return
  }
  func.func @transform_0(%arg0: i32) -> (i32, i32) {
    %c0_i32 = arith.constant 0 : i32
    %c0_i32_0 = arith.constant 0 : i32
    return %c0_i32, %arg0 : i32, i32
  }
  func.func @transform_1(%arg0: i32) -> (i32, i32) {
    %c0_i32 = arith.constant 0 : i32
    %c0_i32_0 = arith.constant 0 : i32
    return %c0_i32, %arg0 : i32, i32
  }
  func.func @transform_2(%arg0: i32) -> (i32, i32) {
    %c0_i32 = arith.constant 0 : i32
    %c0_i32_0 = arith.constant 0 : i32
    %c0_i32_1 = arith.constant 0 : i32
    return %c0_i32, %c0_i32_0 : i32, i32
  }
  func.func @transform_3(%arg0: i32) -> i32 {
    %c0_i32 = arith.constant 0 : i32
    %c0_i32_0 = arith.constant 0 : i32
    return %c0_i32 : i32
  }
  func.func @transform_4(%arg0: i32) -> (i32, i32) {
    %c0_i32 = arith.constant 0 : i32
    %c0_i32_0 = arith.constant 0 : i32
    return %c0_i32, %arg0 : i32, i32
  }
}

</mosaic_0001>

<bundles_post_ra>
// kernel: tpu_custom_call.1
= control target key start
LH: loop header
LB: loop body
LE: loop exit
PB: predicated region body
PF: predicated region fallthrough
CT: control target
= control target key end

     0   :  { %v983_v2 = vmov 0   ;;  %s2347_s0 = inlined_call_operand.vmem [shape: s32[8,128], index: 0, kind: input, shape index: {}]   ;;  %s2348_s1 = inlined_call_operand.vmem [shape: f32[8,128], index: 1, kind: input, shape index: {}]   ;;  %s2349_s2 = inlined_call_operand.vmem [shape: f32[256,1], index: 2, kind: input, shape index: {}]   ;;  %s2350_s3 = inlined_call_operand.<no memory space> [shape: f32[1], index: 3, kind: input, shape index: {}]   ;;  %s2351_s4 = inlined_call_operand.hbm [shape: f32[1,128], index: 4, kind: output, shape index: {}]  }
   0x1   :  { %v646_v0 = vld [vmem:[%s2349_s2 + $0x10] sm:$0xff]  ;;  %v644_v1 = vld [vmem:[%s2349_s2] sm:$0xff]  ;;  %942 = vset.pattern.permute.xlu1 %v983_v2  ;;  %941 = vset.pattern.permute.xlu0 %v983_v2  ;;  %v647_v3 = vld [vmem:[%s2349_s2 + $0x18] sm:$0xff] }
   0x2   :  { %688 = vperm.xlu1 %942, %v646_v0   ;;  %678 = vperm.xlu0 %941, %v644_v1   ;;  %v645_v4 = vld [vmem:[%s2349_s2 + $0x8] sm:$0xff]  ;;  %v648_v6 = vld [vmem:[%s2349_s2 + $0x20] sm:$0xff]  ;;  %v651_v7 = vld [vmem:[%s2349_s2 + $0x38] sm:$0xff] }
   0x3   :  { %v649_v5 = vld [vmem:[%s2349_s2 + $0x28] sm:$0xff]  ;;  %v650_v8 = vld [vmem:[%s2349_s2 + $0x30] sm:$0xff]  ;;  %v652_v10 = vld [vmem:[%s2349_s2 + $0x40] sm:$0xff] }
   0x4   :  { %v653_v9 = vld [vmem:[%s2349_s2 + $0x48] sm:$0xff] }
   0x6   :  { %693 = vperm.xlu1 %942, %v647_v3   ;;  %683 = vperm.xlu0 %941, %v645_v4  }
   0xa   :  { %703 = vperm.xlu1 %942, %v649_v5   ;;  %698 = vperm.xlu0 %941, %v648_v6  }
   0xe   :  { %713 = vperm.xlu1 %942, %v651_v7   ;;  %708 = vperm.xlu0 %941, %v650_v8  }
   0xf   :  { %10 = vsyncpa [#allocation4], 0  ;;  %v655_v11 = vld [vmem:[%s2349_s2 + $0x58] sm:$0xff]  ;;  %v654_v12 = vld [vmem:[%s2349_s2 + $0x50] sm:$0xff]  ;;  %v19_v13 = vlaneseq  ;;  %s984_s11 = smov [#allocation3]  }
  0x10   :  { %v657_v14 = vld [vmem:[%s2349_s2 + $0x68] sm:$0xff]  ;;  %v656_v15 = vld [vmem:[%s2349_s2 + $0x60] sm:$0xff]  ;;  %v659_v17 = vld [vmem:[%s2349_s2 + $0x78] sm:$0xff]  ;;  %s915_s12 = sshll.u32 %s984_s11, 4  ;;  %s916_s12 = int_to_ptr.vmem [resolvable:$true] %s915_s12 }
  0x11   :  { %v1052_v16 = vshrl.u32 %v19_v13, 7  ;;  %v658_v18 = vld [vmem:[%s2349_s2 + $0x70] sm:$0xff]  ;;  %v1066_v20 = vld [vmem:[%s2347_s0] ss:$0 sm:$0xff]  ;;  %v661_v21 = vld [vmem:[%s2349_s2 + $0x88] sm:$0xff]  ;;  %s959_s13 = scalar_lea.vmem %s916_s12, 16  ;;  %p964_p1 = scmp.lt.s32.totalorder %s916_s12, %s916_s12 }
  0x12   :  { %723 = vperm.xlu1 %942, %v653_v9   ;;  %718 = vperm.xlu0 %941, %v652_v10   ;;  %v660_v22 = vld [vmem:[%s2349_s2 + $0x80] sm:$0xff]  ;;  %v663_v27 = vld [vmem:[%s2349_s2 + $0x98] sm:$0xff]  ;;  %v662_v28 = vld [vmem:[%s2349_s2 + $0x90] sm:$0xff]  ;;  %p960_p0 = scmp.ne.s32.totalorder %s916_s12, %s959_s13  ;;  %s963_s14 = scalar_lea.vmem %s916_s12, 32 }
  0x13   :  { %v1061_v19 = vadd.s32 16, %v1052_v16  ;;  %v1077_v23 = vadd.s32 24, %v1052_v16  ;;  %v1082_v24 = vld [vmem:[%s2348_s1] ss:$0 sm:$0xff]  ;;  %v1087_v25 = vld [vmem:[%s2347_s0 + $0x1] ss:$0 sm:$0xff]  ;;  %vm58_vm2 = vcmp.eq.s32.totalorder %v1052_v16, %v1066_v20  ;;  %p965_p2 = scmp.lt.s32.totalorder %s963_s14, %s959_s13 }
  0x14   :  { %v1105_v29 = vld [vmem:[%s2348_s1 + $0x1] ss:$0 sm:$0xff]  ;;  %v1110_v30 = vld [vmem:[%s2347_s0 + $0x2] ss:$0 sm:$0xff]  ;;  %v94_v32 = vsel %vm58_vm2, %v1082_v24, 0.0  ;;  %vm132_vm5 = vcmp.eq.s32.totalorder %v1052_v16, %v1087_v25  ;;  %v665_v33 = vld [vmem:[%s2349_s2 + $0xa8] sm:$0xff] }
  0x15   :  { %vm60_vm0 = vcmp.eq.s32.totalorder %v1061_v19, %v1066_v20  ;;  %vm134_vm1 = vcmp.eq.s32.totalorder %v1061_v19, %v1087_v25  ;;  %vm61_vm3 = vcmp.eq.s32.totalorder %v1077_v23, %v1066_v20  ;;  %vm208_vm4 = vcmp.eq.s32.totalorder %v1061_v19, %v1110_v30  ;;  %v664_v36 = vld [vmem:[%s2349_s2 + $0xa0] sm:$0xff]  ;;  %v667_v44 = vld [vmem:[%s2349_s2 + $0xb8] sm:$0xff]  ;;  %v666_v45 = vld [vmem:[%s2349_s2 + $0xb0] sm:$0xff]  ;;  %p966_p3 = por %p965_p2, %p964_p1 }
  0x16   :  { %733 = vperm.xlu1 %942, %v655_v11   ;;  %728 = vperm.xlu0 %941, %v654_v12   ;;  %v96_v26 = vsel %vm60_vm0, %v1082_v24, 0.0  ;;  %v97_v34 = vsel %vm61_vm3, %v1082_v24, 0.0  ;;  %vm135_vm6 = vcmp.eq.s32.totalorder %v1077_v23, %v1087_v25  ;;  %v1125_v35 = vadd.s32 8, %v1052_v16  ;;  %v1133_v37 = vld [vmem:[%s2348_s1 + $0x2] ss:$0 sm:$0xff]  ;;  %v669_v55 = vld [vmem:[%s2349_s2 + $0xc8] sm:$0xff] }
  0x17   :  { %v170_v31 = vsel %vm134_vm1, %v1105_v29, %v96_v26  ;;  %v1138_v38 = vld [vmem:[%s2347_s0 + $0x3] ss:$0 sm:$0xff]  ;;  %v168_v40 = vsel %vm132_vm5, %v1105_v29, %v94_v32  ;;  %vm206_vm8 = vcmp.eq.s32.totalorder %v1052_v16, %v1110_v30  ;;  %v171_v41 = vsel %vm135_vm6, %v1105_v29, %v97_v34  ;;  %v1157_v43 = vld [vmem:[%s2347_s0 + $0x4] ss:$0 sm:$0xff]  ;;  %v1176_v48 = vld [vmem:[%s2347_s0 + $0x5] ss:$0 sm:$0xff]  ;;  %p967_p4 = pnand %p966_p3, %p960_p0 }
  0x18   :  { %v244_v39 = vsel %vm208_vm4, %v1133_v37, %v170_v31  ;;  %vm282_vm7 = vcmp.eq.s32.totalorder %v1061_v19, %v1138_v38  ;;  %vm209_vm9 = vcmp.eq.s32.totalorder %v1077_v23, %v1110_v30  ;;  %v1152_v42 = vld [vmem:[%s2348_s1 + $0x3] ss:$0 sm:$0xff]  ;;  %vm59_vm10 = vcmp.eq.s32.totalorder %v1125_v35, %v1066_v20  ;;  %v1187_v51 = vld [vmem:[%s2348_s1 + $0x4] ss:$0 sm:$0xff]  ;;  %v1210_v58 = vld [vmem:[%s2348_s1 + $0x5] ss:$0 sm:$0xff] }
  0x19   :  { %v318_v46 = vsel %vm282_vm7, %v1152_v42, %v244_v39  ;;  %vm356_vm11 = vcmp.eq.s32.totalorder %v1061_v19, %v1157_v43  ;;  %v242_v47 = vsel %vm206_vm8, %v1133_v37, %v168_v40  ;;  %vm280_vm12 = vcmp.eq.s32.totalorder %v1052_v16, %v1138_v38  ;;  %v668_v56 = vld [vmem:[%s2349_s2 + $0xc0] sm:$0xff]  ;;  %v671_v0 = vld [vmem:[%s2349_s2 + $0xd8] sm:$0xff]  ;;  %v670_v4 = vld [vmem:[%s2349_s2 + $0xd0] sm:$0xff] }
  0x1a   :  { %743 = vperm.xlu1 %942, %v657_v14   ;;  %738 = vperm.xlu0 %941, %v656_v15   ;;  %v245_v49 = vsel %vm209_vm9, %v1133_v37, %v171_v41  ;;  %vm283_vm13 = vcmp.eq.s32.totalorder %v1077_v23, %v1138_v38  ;;  %v1182_v50 = vadd.s32 40, %v1052_v16  ;;  %vm430_vm14 = vcmp.eq.s32.totalorder %v1061_v19, %v1176_v48  ;;  %v1215_v59 = vld [vmem:[%s2347_s0 + $0x6] ss:$0 sm:$0xff]  ;;  %v1257_v6 = vld [vmem:[%s2347_s0 + $0x7] ss:$0 sm:$0xff]  ;;  %v674_v34 = vld [vmem:[%s2349_s2 + $0xf0] sm:$0xff] }
  0x1b   :  { %v95_v52 = vsel %vm59_vm10, %v1082_v24, 0.0  ;;  %vm133_vm15 = vcmp.eq.s32.totalorder %v1125_v35, %v1087_v25  ;;  %v392_v53 = vsel %vm356_vm11, %v1187_v51, %v318_v46  ;;  %v316_v54 = vsel %vm280_vm12, %v1152_v42, %v242_v47  ;;  %v1252_v5 = vld [vmem:[%s2348_s1 + $0x6] ss:$0 sm:$0xff]  ;;  %v1293_v12 = vld [vmem:[%s2348_s1 + $0x7] ss:$0 sm:$0xff] }
  0x1c   :  { %vm354_vm0 = vcmp.eq.s32.totalorder %v1052_v16, %v1157_v43  ;;  %v319_v57 = vsel %vm283_vm13, %v1152_v42, %v245_v49  ;;  %vm357_vm1 = vcmp.eq.s32.totalorder %v1077_v23, %v1157_v43  ;;  %v169_v60 = vsel %vm133_vm15, %v1105_v29, %v95_v52 }
  0x1d   :  { %vm207_vm2 = vcmp.eq.s32.totalorder %v1125_v35, %v1110_v30  ;;  %vm63_vm3 = vcmp.eq.s32.totalorder %v1182_v50, %v1066_v20  ;;  %v1223_v61 = vadd.s32 32, %v1052_v16  ;;  %v466_v62 = vsel %vm430_vm14, %v1210_v58, %v392_v53 }
  0x1e   :  { %753 = vperm.xlu1 %942, %v659_v17   ;;  %748 = vperm.xlu0 %941, %v658_v18   ;;  %vm504_vm4 = vcmp.eq.s32.totalorder %v1061_v19, %v1215_v59  ;;  %v390_v63 = vsel %vm354_vm0, %v1187_v51, %v316_v54  ;;  %vm428_vm5 = vcmp.eq.s32.totalorder %v1052_v16, %v1176_v48  ;;  %v1241_v2 = vadd.s32 56, %v1052_v16  ;;  %v673_v17 = vld [vmem:[%s2349_s2 + $0xe8] sm:$0xff]  ;;  %v672_v18 = vld [vmem:[%s2349_s2 + $0xe0] sm:$0xff] }
  0x1f   :  { %v393_v1 = vsel %vm357_vm1, %v1187_v51, %v319_v57  ;;  %vm431_vm6 = vcmp.eq.s32.totalorder %v1077_v23, %v1176_v48  ;;  %v1244_v3 = vadd.s32 48, %v1052_v16  ;;  %v243_v7 = vsel %vm207_vm2, %v1133_v37, %v169_v60 }
  0x20   :  { %vm281_vm7 = vcmp.eq.s32.totalorder %v1125_v35, %v1138_v38  ;;  %v99_v8 = vsel %vm63_vm3, %v1082_v24, 0.0  ;;  %vm137_vm8 = vcmp.eq.s32.totalorder %v1182_v50, %v1087_v25  ;;  %v540_v9 = vsel %vm504_vm4, %v1252_v5, %v466_v62 }
  0x21   :  { %vm578_vm9 = vcmp.eq.s32.totalorder %v1061_v19, %v1257_v6  ;;  %v464_v10 = vsel %vm428_vm5, %v1210_v58, %v390_v63  ;;  %vm502_vm10 = vcmp.eq.s32.totalorder %v1052_v16, %v1215_v59  ;;  %v467_v11 = vsel %vm431_vm6, %v1210_v58, %v393_v1 }
  0x22   :  { %763 = vperm.xlu1 %942, %v661_v21   ;;  %758 = vperm.xlu0 %941, %v660_v22   ;;  %vm505_vm11 = vcmp.eq.s32.totalorder %v1077_v23, %v1215_v59  ;;  %vm355_vm12 = vcmp.eq.s32.totalorder %v1125_v35, %v1157_v43  ;;  %vm62_vm13 = vcmp.eq.s32.totalorder %v1223_v61, %v1066_v20  ;;  %v1300_v15 = vadd.s32 72, %v1052_v16 }
  0x23   :  { %v317_v13 = vsel %vm281_vm7, %v1152_v42, %v243_v7  ;;  %v173_v14 = vsel %vm137_vm8, %v1105_v29, %v99_v8  ;;  %vm211_vm14 = vcmp.eq.s32.totalorder %v1182_v50, %v1110_v30  ;;  %v1312_v21 = vsel %vm578_vm9, %v1293_v12, %v540_v9 }
  0x24   :  { %v538_v22 = vsel %vm502_vm10, %v1252_v5, %v464_v10  ;;  %vm576_vm15 = vcmp.eq.s32.totalorder %v1052_v16, %v1257_v6  ;;  %vm65_vm0 = vcmp.eq.s32.totalorder %v1241_v2, %v1066_v20  ;;  %vm579_vm1 = vcmp.eq.s32.totalorder %v1077_v23, %v1257_v6 }
  0x25   :  { %vm429_vm2 = vcmp.eq.s32.totalorder %v1125_v35, %v1176_v48  ;;  %v98_v19 = vsel %vm62_vm13, %v1082_v24, 0.0  ;;  %vm136_vm3 = vcmp.eq.s32.totalorder %v1223_v61, %v1087_v25  ;;  %v541_v26 = vsel %vm505_vm11, %v1252_v5, %v467_v11 }
  0x26   :  { %773 = vperm.xlu1 %942, %v663_v27   ;;  %768 = vperm.xlu0 %941, %v662_v28   ;;  %v391_v27 = vsel %vm355_vm12, %v1187_v51, %v317_v13  ;;  %v247_v28 = vsel %vm211_vm14, %v1133_v37, %v173_v14  ;;  %vm285_vm4 = vcmp.eq.s32.totalorder %v1182_v50, %v1138_v38  ;;  %v101_v32 = vsel %vm65_vm0, %v1082_v24, 0.0 }
  0x27   :  { %v1341_v31 = vsel %vm576_vm15, %v1293_v12, %v538_v22  ;;  %vm139_vm5 = vcmp.eq.s32.totalorder %v1241_v2, %v1087_v25  ;;  %vm64_vm6 = vcmp.eq.s32.totalorder %v1244_v3, %v1066_v20  ;;  %vm503_vm7 = vcmp.eq.s32.totalorder %v1125_v35, %v1215_v59 }
  0x28   :  { %vm577_vm8 = vcmp.eq.s32.totalorder %v1125_v35, %v1257_v6  ;;  %vm210_vm9 = vcmp.eq.s32.totalorder %v1223_v61, %v1110_v30  ;;  %v1365_v39 = vsel %vm579_vm1, %v1293_v12, %v541_v26  ;;  %v465_v40 = vsel %vm429_vm2, %v1210_v58, %v391_v27 }
  0x29   :  { %v321_v41 = vsel %vm285_vm4, %v1152_v42, %v247_v28  ;;  %vm359_vm10 = vcmp.eq.s32.totalorder %v1182_v50, %v1157_v43  ;;  %vm213_vm11 = vcmp.eq.s32.totalorder %v1241_v2, %v1110_v30  ;;  %vm138_vm12 = vcmp.eq.s32.totalorder %v1244_v3, %v1087_v25 }
  0x2a   :  { %783 = vperm.xlu1 %942, %v665_v33   ;;  %778 = vperm.xlu0 %941, %v664_v36   ;;  %v675_v33 = vld [vmem:[%s2349_s2 + $0xf8] sm:$0xff]  ;;  %v172_v36 = vsel %vm136_vm3, %v1105_v29, %v98_v19  ;;  %vm284_vm13 = vcmp.eq.s32.totalorder %v1223_v61, %v1138_v38  ;;  %vm67_vm14 = vcmp.eq.s32.totalorder %v1300_v15, %v1066_v20  ;;  %v1386_v46 = vadd.s32 64, %v1052_v16 }
  0x2b   :  { %v246_v23 = vsel %vm210_vm9, %v1133_v37, %v172_v36  ;;  %v539_v47 = vsel %vm503_vm7, %v1252_v5, %v465_v40  ;;  %v395_v49 = vsel %vm359_vm10, %v1187_v51, %v321_v41  ;;  %vm433_vm15 = vcmp.eq.s32.totalorder %v1182_v50, %v1176_v48 }
  0x2c   :  { %v1396_v52 = vadd.s32 88, %v1052_v16  ;;  %vm287_vm0 = vcmp.eq.s32.totalorder %v1241_v2, %v1138_v38  ;;  %vm212_vm1 = vcmp.eq.s32.totalorder %v1244_v3, %v1110_v30  ;;  %vm358_vm2 = vcmp.eq.s32.totalorder %v1223_v61, %v1157_v43 }
  0x2d   :  { %vm141_vm3 = vcmp.eq.s32.totalorder %v1300_v15, %v1087_v25  ;;  %v1414_v57 = vsel %vm577_vm8, %v1293_v12, %v539_v47  ;;  %v469_v60 = vsel %vm433_vm15, %v1210_v58, %v395_v49  ;;  %vm507_vm4 = vcmp.eq.s32.totalorder %v1182_v50, %v1215_v59 }
  0x2e   :  { %793 = vperm.xlu1 %942, %v667_v44   ;;  %788 = vperm.xlu0 %941, %v666_v45   ;;  %v175_v44 = vsel %vm139_vm5, %v1105_v29, %v101_v32  ;;  %v100_v45 = vsel %vm64_vm6, %v1082_v24, 0.0  ;;  %vm66_vm5 = vcmp.eq.s32.totalorder %v1386_v46, %v1066_v20  ;;  %vm361_vm6 = vcmp.eq.s32.totalorder %v1241_v2, %v1157_v43 }
  0x2f   :  { %v249_v53 = vsel %vm213_vm11, %v1133_v37, %v175_v44  ;;  %v174_v54 = vsel %vm138_vm12, %v1105_v29, %v100_v45  ;;  %vm286_vm7 = vcmp.eq.s32.totalorder %v1244_v3, %v1138_v38  ;;  %vm432_vm8 = vcmp.eq.s32.totalorder %v1223_v61, %v1176_v48 }
  0x30   :  { %v323_v62 = vsel %vm287_vm0, %v1152_v42, %v249_v53  ;;  %v248_v63 = vsel %vm212_vm1, %v1133_v37, %v174_v54  ;;  %vm215_vm9 = vcmp.eq.s32.totalorder %v1300_v15, %v1110_v30  ;;  %v543_v1 = vsel %vm507_vm4, %v1252_v5, %v469_v60 }
  0x31   :  { %vm581_vm10 = vcmp.eq.s32.totalorder %v1182_v50, %v1257_v6  ;;  %vm140_vm11 = vcmp.eq.s32.totalorder %v1386_v46, %v1087_v25  ;;  %v397_v7 = vsel %vm361_vm6, %v1187_v51, %v323_v62  ;;  %vm435_vm12 = vcmp.eq.s32.totalorder %v1241_v2, %v1176_v48 }
  0x32   :  { %803 = vperm.xlu1 %942, %v669_v55   ;;  %798 = vperm.xlu0 %941, %v668_v56   ;;  %v320_v55 = vsel %vm284_vm13, %v1152_v42, %v246_v23  ;;  %v103_v56 = vsel %vm67_vm14, %v1082_v24, 0.0  ;;  %v322_v8 = vsel %vm286_vm7, %v1152_v42, %v248_v63  ;;  %vm360_vm13 = vcmp.eq.s32.totalorder %v1244_v3, %v1157_v43 }
  0x33   :  { %v394_v35 = vsel %vm358_vm2, %v1187_v51, %v320_v55  ;;  %vm506_vm14 = vcmp.eq.s32.totalorder %v1223_v61, %v1215_v59  ;;  %vm289_vm15 = vcmp.eq.s32.totalorder %v1300_v15, %v1138_v38  ;;  %v1452_v10 = vsel %vm581_vm10, %v1293_v12, %v543_v1 }
  0x34   :  { %v468_v9 = vsel %vm432_vm8, %v1210_v58, %v394_v35  ;;  %vm214_vm0 = vcmp.eq.s32.totalorder %v1386_v46, %v1110_v30  ;;  %v1458_v13 = vadd.s32 80, %v1052_v16  ;;  %v471_v14 = vsel %vm435_vm12, %v1210_v58, %v397_v7 }
  0x35   :  { %vm509_vm1 = vcmp.eq.s32.totalorder %v1241_v2, %v1215_v59  ;;  %vm434_vm2 = vcmp.eq.s32.totalorder %v1244_v3, %v1176_v48  ;;  %vm363_vm4 = vcmp.eq.s32.totalorder %v1300_v15, %v1157_v43  ;;  %vm69_vm6 = vcmp.eq.s32.totalorder %v1396_v52, %v1066_v20 }
  0x36   :  { %813 = vperm.xlu1 %942, %v671_v0   ;;  %808 = vperm.xlu0 %941, %v670_v4   ;;  %v177_v0 = vsel %vm141_vm3, %v1105_v29, %v103_v56  ;;  %v102_v4 = vsel %vm66_vm5, %v1082_v24, 0.0  ;;  %vm580_vm3 = vcmp.eq.s32.totalorder %v1223_v61, %v1257_v6  ;;  %vm288_vm5 = vcmp.eq.s32.totalorder %v1386_v46, %v1138_v38 }
  0x37   :  { %v251_v50 = vsel %vm215_vm9, %v1133_v37, %v177_v0  ;;  %v176_v11 = vsel %vm140_vm11, %v1105_v29, %v102_v4  ;;  %v1478_v26 = vadd.s32 104, %v1052_v16  ;;  %v545_v27 = vsel %vm509_vm1, %v1252_v5, %v471_v14 }
  0x38   :  { %v325_v22 = vsel %vm289_vm15, %v1152_v42, %v251_v50  ;;  %v250_v19 = vsel %vm214_vm0, %v1133_v37, %v176_v11  ;;  %vm583_vm7 = vcmp.eq.s32.totalorder %v1241_v2, %v1257_v6  ;;  %vm508_vm8 = vcmp.eq.s32.totalorder %v1244_v3, %v1215_v59 }
  0x39   :  { %v399_v32 = vsel %vm363_vm4, %v1187_v51, %v325_v22  ;;  %vm437_vm9 = vcmp.eq.s32.totalorder %v1300_v15, %v1176_v48  ;;  %vm362_vm10 = vcmp.eq.s32.totalorder %v1386_v46, %v1157_v43  ;;  %v105_v2 = vsel %vm69_vm6, %v1082_v24, 0.0 }
  0x3a   :  { %823 = vperm.xlu1 %942, %v673_v17   ;;  %818 = vperm.xlu0 %941, %v672_v18   ;;  %v396_v17 = vsel %vm360_vm13, %v1187_v51, %v322_v8  ;;  %v542_v18 = vsel %vm506_vm14, %v1252_v5, %v468_v9  ;;  %vm143_vm11 = vcmp.eq.s32.totalorder %v1396_v52, %v1087_v25  ;;  %v1508_v41 = vadd.s32 120, %v1052_v16 }
  0x3b   :  { %v470_v61 = vsel %vm434_vm2, %v1210_v58, %v396_v17  ;;  %v1487_v28 = vsel %vm580_vm3, %v1293_v12, %v542_v18  ;;  %v1502_v36 = vsel %vm583_vm7, %v1293_v12, %v545_v27  ;;  %vm582_vm12 = vcmp.eq.s32.totalorder %v1244_v3, %v1257_v6 }
  0x3c   :  { %v544_v40 = vsel %vm508_vm8, %v1252_v5, %v470_v61  ;;  %v473_v44 = vsel %vm437_vm9, %v1210_v58, %v399_v32  ;;  %vm511_vm13 = vcmp.eq.s32.totalorder %v1300_v15, %v1215_v59  ;;  %vm68_vm14 = vcmp.eq.s32.totalorder %v1458_v13, %v1066_v20 }
  0x3d   :  { %v1516_v45 = vadd.s32 112, %v1052_v16  ;;  %vm436_vm15 = vcmp.eq.s32.totalorder %v1386_v46, %v1176_v48  ;;  %v179_v3 = vsel %vm143_vm11, %v1105_v29, %v105_v2  ;;  %vm217_vm0 = vcmp.eq.s32.totalorder %v1396_v52, %v1110_v30 }
  0x3e   :  { %833 = vperm.xlu1 %942, %v675_v33   ;;  %828 = vperm.xlu0 %941, %v674_v34   ;;  %v1493_v33 = vadd.s32 96, %v1052_v16  ;;  %v324_v34 = vsel %vm288_vm5, %v1152_v42, %v250_v19  ;;  %v1525_v47 = vsel %vm582_vm12, %v1293_v12, %v544_v40  ;;  %vm585_vm1 = vcmp.eq.s32.totalorder %v1300_v15, %v1257_v6 }
  0x3f   :  { %v398_v23 = vsel %vm362_vm10, %v1187_v51, %v324_v34  ;;  %vm71_vm2 = vcmp.eq.s32.totalorder %v1478_v26, %v1066_v20  ;;  %v547_v49 = vsel %vm511_vm13, %v1252_v5, %v473_v44  ;;  %v104_v53 = vsel %vm68_vm14, %v1082_v24, 0.0 }
  0x40   :  { %vm70_vm3 = vcmp.eq.s32.totalorder %v1493_v33, %v1066_v20  ;;  %vm142_vm4 = vcmp.eq.s32.totalorder %v1458_v13, %v1087_v25  ;;  %v1538_v54 = vadd.s32 136, %v1052_v16  ;;  %v472_v55 = vsel %vm436_vm15, %v1210_v58, %v398_v23 }
  0x41   :  { %vm510_vm5 = vcmp.eq.s32.totalorder %v1386_v46, %v1215_v59  ;;  %v253_v15 = vsel %vm217_vm0, %v1133_v37, %v179_v3  ;;  %vm291_vm6 = vcmp.eq.s32.totalorder %v1396_v52, %v1138_v38  ;;  %v107_v56 = vsel %vm71_vm2, %v1082_v24, 0.0 }
  0x42   :  { %vm145_vm7 = vcmp.eq.s32.totalorder %v1478_v26, %v1087_v25  ;;  %v106_v60 = vsel %vm70_vm3, %v1082_v24, 0.0  ;;  %vm144_vm8 = vcmp.eq.s32.totalorder %v1493_v33, %v1087_v25  ;;  %v1553_v62 = vsel %vm585_vm1, %v1293_v12, %v547_v49 }
  0x43   :  { %v178_v63 = vsel %vm142_vm4, %v1105_v29, %v104_v53  ;;  %vm216_vm9 = vcmp.eq.s32.totalorder %v1458_v13, %v1110_v30  ;;  %vm73_vm10 = vcmp.eq.s32.totalorder %v1508_v41, %v1066_v20  ;;  %v546_v35 = vsel %vm510_vm5, %v1252_v5, %v472_v55 }
  0x44   :  { %vm584_vm11 = vcmp.eq.s32.totalorder %v1386_v46, %v1257_v6  ;;  %v327_v0 = vsel %vm291_vm6, %v1152_v42, %v253_v15  ;;  %vm365_vm12 = vcmp.eq.s32.totalorder %v1396_v52, %v1157_v43  ;;  %v181_v1 = vsel %vm145_vm7, %v1105_v29, %v107_v56 }
  0x45   :  { %vm219_vm13 = vcmp.eq.s32.totalorder %v1478_v26, %v1110_v30  ;;  %v180_v4 = vsel %vm144_vm8, %v1105_v29, %v106_v60  ;;  %vm218_vm14 = vcmp.eq.s32.totalorder %v1493_v33, %v1110_v30  ;;  %v252_v7 = vsel %vm216_vm9, %v1133_v37, %v178_v63 }
  0x46   :  { %vm290_vm15 = vcmp.eq.s32.totalorder %v1458_v13, %v1138_v38  ;;  %v109_v46 = vsel %vm73_vm10, %v1082_v24, 0.0  ;;  %vm147_vm0 = vcmp.eq.s32.totalorder %v1508_v41, %v1087_v25  ;;  %v1579_v8 = vsel %vm584_vm11, %v1293_v12, %v546_v35 }
  0x47   :  { %v401_v9 = vsel %vm365_vm12, %v1187_v51, %v327_v0  ;;  %vm439_vm1 = vcmp.eq.s32.totalorder %v1396_v52, %v1176_v48  ;;  %v1585_v50 = vadd.s32 128, %v1052_v16  ;;  %v255_v11 = vsel %vm219_vm13, %v1133_v37, %v181_v1 }
  0x48   :  { %vm293_vm2 = vcmp.eq.s32.totalorder %v1478_v26, %v1138_v38  ;;  %v254_v14 = vsel %vm218_vm14, %v1133_v37, %v180_v4  ;;  %vm292_vm3 = vcmp.eq.s32.totalorder %v1493_v33, %v1138_v38  ;;  %v326_v17 = vsel %vm290_vm15, %v1152_v42, %v252_v7 }
  0x49   :  { %vm364_vm4 = vcmp.eq.s32.totalorder %v1458_v13, %v1157_v43  ;;  %v183_v18 = vsel %vm147_vm0, %v1105_v29, %v109_v46  ;;  %vm221_vm5 = vcmp.eq.s32.totalorder %v1508_v41, %v1110_v30  ;;  %v475_v22 = vsel %vm439_vm1, %v1210_v58, %v401_v9 }
  0x4a   :  { %vm513_vm6 = vcmp.eq.s32.totalorder %v1396_v52, %v1215_v59  ;;  %vm587_vm7 = vcmp.eq.s32.totalorder %v1396_v52, %v1257_v6  ;;  %vm72_vm8 = vcmp.eq.s32.totalorder %v1516_v45, %v1066_v20  ;;  %v329_v19 = vsel %vm293_vm2, %v1152_v42, %v255_v11 }
  0x4b   :  { %vm367_vm9 = vcmp.eq.s32.totalorder %v1478_v26, %v1157_v43  ;;  %v328_v27 = vsel %vm292_vm3, %v1152_v42, %v254_v14  ;;  %vm366_vm10 = vcmp.eq.s32.totalorder %v1493_v33, %v1157_v43  ;;  %v400_v61 = vsel %vm364_vm4, %v1187_v51, %v326_v17 }
  0x4c   :  { %vm438_vm11 = vcmp.eq.s32.totalorder %v1458_v13, %v1176_v48  ;;  %v257_v32 = vsel %vm221_vm5, %v1133_v37, %v183_v18  ;;  %vm295_vm12 = vcmp.eq.s32.totalorder %v1508_v41, %v1138_v38  ;;  %v549_v34 = vsel %vm513_vm6, %v1252_v5, %v475_v22 }
  0x4d   :  { %v108_v2 = vsel %vm72_vm8, %v1082_v24, 0.0  ;;  %vm146_vm13 = vcmp.eq.s32.totalorder %v1516_v45, %v1087_v25  ;;  %v1623_v40 = vadd.s32 152, %v1052_v16  ;;  %v403_v44 = vsel %vm367_vm9, %v1187_v51, %v329_v19 }
  0x4e   :  { %vm441_vm14 = vcmp.eq.s32.totalorder %v1478_v26, %v1176_v48  ;;  %v402_v23 = vsel %vm366_vm10, %v1187_v51, %v328_v27  ;;  %vm440_vm15 = vcmp.eq.s32.totalorder %v1493_v33, %v1176_v48  ;;  %v474_v3 = vsel %vm438_vm11, %v1210_v58, %v400_v61 }
  0x4f   :  { %vm512_vm0 = vcmp.eq.s32.totalorder %v1458_v13, %v1215_v59  ;;  %v331_v49 = vsel %vm295_vm12, %v1152_v42, %v257_v32  ;;  %vm369_vm1 = vcmp.eq.s32.totalorder %v1508_v41, %v1157_v43  ;;  %vm586_vm2 = vcmp.eq.s32.totalorder %v1458_v13, %v1257_v6 }
  0x50   :  { %v182_v53 = vsel %vm146_vm13, %v1105_v29, %v108_v2  ;;  %vm220_vm3 = vcmp.eq.s32.totalorder %v1516_v45, %v1110_v30  ;;  %vm75_vm4 = vcmp.eq.s32.totalorder %v1538_v54, %v1066_v20  ;;  %v477_v55 = vsel %vm441_vm14, %v1210_v58, %v403_v44 }
  0x51   :  { %vm515_vm5 = vcmp.eq.s32.totalorder %v1478_v26, %v1215_v59  ;;  %v476_v15 = vsel %vm440_vm15, %v1210_v58, %v402_v23  ;;  %vm514_vm6 = vcmp.eq.s32.totalorder %v1493_v33, %v1215_v59  ;;  %v548_v56 = vsel %vm512_vm0, %v1252_v5, %v474_v3 }
  0x52   :  { %v405_v60 = vsel %vm369_vm1, %v1187_v51, %v331_v49  ;;  %vm443_vm8 = vcmp.eq.s32.totalorder %v1508_v41, %v1176_v48  ;;  %v1655_v63 = vadd.s32 144, %v1052_v16  ;;  %v256_v35 = vsel %vm220_vm3, %v1133_v37, %v182_v53 }
  0x53   :  { %vm294_vm9 = vcmp.eq.s32.totalorder %v1516_v45, %v1138_v38  ;;  %v111_v0 = vsel %vm75_vm4, %v1082_v24, 0.0  ;;  %vm149_vm10 = vcmp.eq.s32.totalorder %v1538_v54, %v1087_v25  ;;  %v551_v1 = vsel %vm515_vm5, %v1252_v5, %v477_v55 }
  0x54   :  { %vm589_vm11 = vcmp.eq.s32.totalorder %v1478_v26, %v1257_v6  ;;  %v550_v4 = vsel %vm514_vm6, %v1252_v5, %v476_v15  ;;  %vm588_vm12 = vcmp.eq.s32.totalorder %v1493_v33, %v1257_v6  ;;  %v1673_v7 = vsel %vm587_vm7, %v1293_v12, %v549_v34 }
  0x55   :  { %v479_v46 = vsel %vm443_vm8, %v1210_v58, %v405_v60  ;;  %vm517_vm13 = vcmp.eq.s32.totalorder %v1508_v41, %v1215_v59  ;;  %vm368_vm14 = vcmp.eq.s32.totalorder %v1516_v45, %v1157_v43  ;;  %v330_v26 = vsel %vm294_vm9, %v1152_v42, %v256_v35 }
  0x56   :  { %v185_v9 = vsel %vm149_vm10, %v1105_v29, %v111_v0  ;;  %vm223_vm15 = vcmp.eq.s32.totalorder %v1538_v54, %v1110_v30  ;;  %vm74_vm0 = vcmp.eq.s32.totalorder %v1585_v50, %v1066_v20  ;;  %v1690_v52 = vsel %vm586_vm2, %v1293_v12, %v548_v56 }
  0x57   :  { %v1693_v33 = vsel %vm589_vm11, %v1293_v12, %v551_v1  ;;  %v1696_v11 = vsel %vm588_vm12, %v1293_v12, %v550_v4  ;;  %vm77_vm7 = vcmp.eq.s32.totalorder %v1623_v40, %v1066_v20  ;;  %v553_v14 = vsel %vm517_vm13, %v1252_v5, %v479_v46 }
  0x58   :  { %vm591_vm1 = vcmp.eq.s32.totalorder %v1508_v41, %v1257_v6  ;;  %vm442_vm3 = vcmp.eq.s32.totalorder %v1516_v45, %v1176_v48  ;;  %vm76_vm2 = vcmp.eq.s32.totalorder %v1655_v63, %v1066_v20  ;;  %v404_v13 = vsel %vm368_vm14, %v1187_v51, %v330_v26 }
  0x59   :  { %v259_v17 = vsel %vm223_vm15, %v1133_v37, %v185_v9  ;;  %vm297_vm4 = vcmp.eq.s32.totalorder %v1538_v54, %v1138_v38  ;;  %v110_v18 = vsel %vm74_vm0, %v1082_v24, 0.0  ;;  %vm148_vm5 = vcmp.eq.s32.totalorder %v1585_v50, %v1087_v25 }
  0x5a   :  { %v113_v41 = vsel %vm77_vm7, %v1082_v24, 0.0  ;;  %vm151_vm6 = vcmp.eq.s32.totalorder %v1623_v40, %v1087_v25  ;;  %v1718_v22 = vadd.s32 168, %v1052_v16  ;;  %v1721_v19 = vsel %vm591_vm1, %v1293_v12, %v553_v14 }
  0x5b   :  { %vm516_vm8 = vcmp.eq.s32.totalorder %v1516_v45, %v1215_v59  ;;  %v112_v27 = vsel %vm76_vm2, %v1082_v24, 0.0  ;;  %vm150_vm9 = vcmp.eq.s32.totalorder %v1655_v63, %v1087_v25  ;;  %v478_v61 = vsel %vm442_vm3, %v1210_v58, %v404_v13 }
  0x5c   :  { %vm590_vm10 = vcmp.eq.s32.totalorder %v1516_v45, %v1257_v6  ;;  %v333_v32 = vsel %vm297_vm4, %v1152_v42, %v259_v17  ;;  %vm371_vm11 = vcmp.eq.s32.totalorder %v1538_v54, %v1157_v43  ;;  %v184_v34 = vsel %vm148_vm5, %v1105_v29, %v110_v18 }
  0x5d   :  { %vm222_vm12 = vcmp.eq.s32.totalorder %v1585_v50, %v1110_v30  ;;  %v187_v2 = vsel %vm151_vm6, %v1105_v29, %v113_v41  ;;  %vm225_vm13 = vcmp.eq.s32.totalorder %v1623_v40, %v1110_v30  ;;  %v186_v44 = vsel %vm150_vm9, %v1105_v29, %v112_v27 }
  0x5e   :  { %vm224_vm14 = vcmp.eq.s32.totalorder %v1655_v63, %v1110_v30  ;;  %vm79_vm15 = vcmp.eq.s32.totalorder %v1718_v22, %v1066_v20  ;;  %v1746_v23 = vadd.s32 160, %v1052_v16  ;;  %v552_v3 = vsel %vm516_vm8, %v1252_v5, %v478_v61 }
  0x5f   :  { %v407_v49 = vsel %vm371_vm11, %v1187_v51, %v333_v32  ;;  %vm445_vm0 = vcmp.eq.s32.totalorder %v1538_v54, %v1176_v48  ;;  %vm519_vm7 = vcmp.eq.s32.totalorder %v1538_v54, %v1215_v59  ;;  %v258_v53 = vsel %vm222_vm12, %v1133_v37, %v184_v34 }
  0x60   :  { %vm296_vm1 = vcmp.eq.s32.totalorder %v1585_v50, %v1138_v38  ;;  %v261_v55 = vsel %vm225_vm13, %v1133_v37, %v187_v2  ;;  %vm299_vm3 = vcmp.eq.s32.totalorder %v1623_v40, %v1138_v38  ;;  %v260_v15 = vsel %vm224_vm14, %v1133_v37, %v186_v44 }
  0x61   :  { %vm298_vm2 = vcmp.eq.s32.totalorder %v1655_v63, %v1138_v38  ;;  %v115_v56 = vsel %vm79_vm15, %v1082_v24, 0.0  ;;  %vm153_vm4 = vcmp.eq.s32.totalorder %v1718_v22, %v1087_v25  ;;  %v1770_v60 = vsel %vm590_vm10, %v1293_v12, %v552_v3 }
  0x62   :  { %v481_v35 = vsel %vm445_vm0, %v1210_v58, %v407_v49  ;;  %vm370_vm5 = vcmp.eq.s32.totalorder %v1585_v50, %v1157_v43  ;;  %vm78_vm6 = vcmp.eq.s32.totalorder %v1746_v23, %v1066_v20  ;;  %v332_v0 = vsel %vm296_vm1, %v1152_v42, %v258_v53 }
  0x63   :  { %v335_v1 = vsel %vm299_vm3, %v1152_v42, %v261_v55  ;;  %vm373_vm8 = vcmp.eq.s32.totalorder %v1623_v40, %v1157_v43  ;;  %vm372_vm9 = vcmp.eq.s32.totalorder %v1655_v63, %v1157_v43  ;;  %v334_v45 = vsel %vm298_vm2, %v1152_v42, %v260_v15 }
  0x64   :  { %v189_v4 = vsel %vm153_vm4, %v1105_v29, %v115_v56  ;;  %vm227_vm10 = vcmp.eq.s32.totalorder %v1718_v22, %v1110_v30  ;;  %v1788_v46 = vadd.s32 184, %v1052_v16  ;;  %v555_v26 = vsel %vm519_vm7, %v1252_v5, %v481_v35 }
  0x65   :  { %vm593_vm11 = vcmp.eq.s32.totalorder %v1538_v54, %v1257_v6  ;;  %v114_v9 = vsel %vm78_vm6, %v1082_v24, 0.0  ;;  %vm152_vm12 = vcmp.eq.s32.totalorder %v1746_v23, %v1087_v25  ;;  %v406_v14 = vsel %vm370_vm5, %v1187_v51, %v332_v0 }
  0x66   :  { %vm444_vm13 = vcmp.eq.s32.totalorder %v1585_v50, %v1176_v48  ;;  %v409_v13 = vsel %vm373_vm8, %v1187_v51, %v335_v1  ;;  %vm447_vm14 = vcmp.eq.s32.totalorder %v1623_v40, %v1176_v48  ;;  %v408_v17 = vsel %vm372_vm9, %v1187_v51, %v334_v45 }
  0x67   :  { %vm446_vm15 = vcmp.eq.s32.totalorder %v1655_v63, %v1176_v48  ;;  %v263_v18 = vsel %vm227_vm10, %v1133_v37, %v189_v4  ;;  %vm301_vm0 = vcmp.eq.s32.totalorder %v1718_v22, %v1138_v38  ;;  %vm518_vm7 = vcmp.eq.s32.totalorder %v1585_v50, %v1215_v59 }
  0x68   :  { %v188_v41 = vsel %vm152_vm12, %v1105_v29, %v114_v9  ;;  %vm226_vm1 = vcmp.eq.s32.totalorder %v1746_v23, %v1110_v30  ;;  %vm81_vm3 = vcmp.eq.s32.totalorder %v1788_v46, %v1066_v20  ;;  %v480_v27 = vsel %vm444_vm13, %v1210_v58, %v406_v14 }
  0x69   :  { %v483_v61 = vsel %vm447_vm14, %v1210_v58, %v409_v13  ;;  %vm521_vm2 = vcmp.eq.s32.totalorder %v1623_v40, %v1215_v59  ;;  %vm520_vm4 = vcmp.eq.s32.totalorder %v1655_v63, %v1215_v59  ;;  %v482_v32 = vsel %vm446_vm15, %v1210_v58, %v408_v17 }
  0x6a   :  { %v337_v34 = vsel %vm301_vm0, %v1152_v42, %v263_v18  ;;  %vm375_vm5 = vcmp.eq.s32.totalorder %v1718_v22, %v1157_v43  ;;  %v1829_v2 = vadd.s32 176, %v1052_v16  ;;  %v262_v44 = vsel %vm226_vm1, %v1133_v37, %v188_v41 }
  0x6b   :  { %vm300_vm6 = vcmp.eq.s32.totalorder %v1746_v23, %v1138_v38  ;;  %v117_v3 = vsel %vm81_vm3, %v1082_v24, 0.0  ;;  %vm155_vm8 = vcmp.eq.s32.totalorder %v1788_v46, %v1087_v25  ;;  %v554_v49 = vsel %vm518_vm7, %v1252_v5, %v480_v27 }
  0x6c   :  { %vm592_vm9 = vcmp.eq.s32.totalorder %v1585_v50, %v1257_v6  ;;  %v557_v53 = vsel %vm521_vm2, %v1252_v5, %v483_v61  ;;  %vm595_vm10 = vcmp.eq.s32.totalorder %v1623_v40, %v1257_v6  ;;  %v556_v55 = vsel %vm520_vm4, %v1252_v5, %v482_v32 }
  0x6d   :  { %vm594_vm12 = vcmp.eq.s32.totalorder %v1655_v63, %v1257_v6  ;;  %v411_v15 = vsel %vm375_vm5, %v1187_v51, %v337_v34  ;;  %vm449_vm13 = vcmp.eq.s32.totalorder %v1718_v22, %v1176_v48  ;;  %v336_v0 = vsel %vm300_vm6, %v1152_v42, %v262_v44 }
  0x6e   :  { %vm374_vm14 = vcmp.eq.s32.totalorder %v1746_v23, %v1157_v43  ;;  %v191_v50 = vsel %vm155_vm8, %v1105_v29, %v117_v3  ;;  %vm229_vm15 = vcmp.eq.s32.totalorder %v1788_v46, %v1110_v30  ;;  %v1862_v40 = vsel %vm593_vm11, %v1293_v12, %v555_v26 }
  0x6f   :  { %v1865_v63 = vsel %vm592_vm9, %v1293_v12, %v554_v49  ;;  %vm80_vm0 = vcmp.eq.s32.totalorder %v1829_v2, %v1066_v20  ;;  %v1870_v1 = vadd.s32 200, %v1052_v16  ;;  %v1873_v45 = vsel %vm595_vm10, %v1293_v12, %v557_v53 }
  0x70   :  { %v1876_v4 = vsel %vm594_vm12, %v1293_v12, %v556_v55  ;;  %vm523_vm7 = vcmp.eq.s32.totalorder %v1718_v22, %v1215_v59  ;;  %vm448_vm11 = vcmp.eq.s32.totalorder %v1746_v23, %v1176_v48  ;;  %v485_v54 = vsel %vm449_vm13, %v1210_v58, %v411_v15 }
  0x71   :  { %v410_v26 = vsel %vm374_vm14, %v1187_v51, %v336_v0  ;;  %v265_v9 = vsel %vm229_vm15, %v1133_v37, %v191_v50  ;;  %vm303_vm1 = vcmp.eq.s32.totalorder %v1788_v46, %v1138_v38  ;;  %vm597_vm3 = vcmp.eq.s32.totalorder %v1718_v22, %v1257_v6 }
  0x72   :  { %vm522_vm2 = vcmp.eq.s32.totalorder %v1746_v23, %v1215_v59  ;;  %v116_v17 = vsel %vm80_vm0, %v1082_v24, 0.0  ;;  %vm154_vm4 = vcmp.eq.s32.totalorder %v1829_v2, %v1087_v25  ;;  %vm83_vm5 = vcmp.eq.s32.totalorder %v1870_v1, %v1066_v20 }
  0x73   :  { %v1899_v27 = vadd.s32 192, %v1052_v16  ;;  %v559_v61 = vsel %vm523_vm7, %v1252_v5, %v485_v54  ;;  %v484_v32 = vsel %vm448_vm11, %v1210_v58, %v410_v26  ;;  %vm377_vm6 = vcmp.eq.s32.totalorder %v1788_v46, %v1157_v43 }
  0x74   :  { %v190_v44 = vsel %vm154_vm4, %v1105_v29, %v116_v17  ;;  %vm228_vm8 = vcmp.eq.s32.totalorder %v1829_v2, %v1110_v30  ;;  %vm596_vm9 = vcmp.eq.s32.totalorder %v1746_v23, %v1257_v6  ;;  %vm451_vm10 = vcmp.eq.s32.totalorder %v1788_v46, %v1176_v48 }
  0x75   :  { %v119_v53 = vsel %vm83_vm5, %v1082_v24, 0.0  ;;  %vm157_vm12 = vcmp.eq.s32.totalorder %v1870_v1, %v1087_v25  ;;  %vm82_vm13 = vcmp.eq.s32.totalorder %v1899_v27, %v1066_v20  ;;  %v264_v0 = vsel %vm228_vm8, %v1133_v37, %v190_v44 }
  0x76   :  { %vm302_vm14 = vcmp.eq.s32.totalorder %v1829_v2, %v1138_v38  ;;  %v193_v54 = vsel %vm157_vm12, %v1105_v29, %v119_v53  ;;  %vm231_vm15 = vcmp.eq.s32.totalorder %v1870_v1, %v1110_v30  ;;  %vm525_vm0 = vcmp.eq.s32.totalorder %v1788_v46, %v1215_v59 }
  0x77   :  { %vm156_vm7 = vcmp.eq.s32.totalorder %v1899_v27, %v1087_v25  ;;  %v338_v17 = vsel %vm302_vm14, %v1152_v42, %v264_v0  ;;  %vm376_vm11 = vcmp.eq.s32.totalorder %v1829_v2, %v1157_v43  ;;  %vm450_vm4 = vcmp.eq.s32.totalorder %v1829_v2, %v1176_v48 }
  0x78   :  { %v412_v44 = vsel %vm376_vm11, %v1187_v51, %v338_v17  ;;  %vm379_vm5 = vcmp.eq.s32.totalorder %v1870_v1, %v1157_v43  ;;  %vm304_vm8 = vcmp.eq.s32.totalorder %v1899_v27, %v1138_v38  ;;  %vm453_vm12 = vcmp.eq.s32.totalorder %v1870_v1, %v1176_v48 }
  0x79   :  { %vm527_vm14 = vcmp.eq.s32.totalorder %v1870_v1, %v1215_v59  ;;  %vm452_vm11 = vcmp.eq.s32.totalorder %v1899_v27, %v1176_v48 }
  0x81   :  { %v689_v56 = vpop.permute.xlu1 %688  ;;  %v679_v35 = vpop.permute.xlu0 %678 }
  0x82   :  { %v836_v18 = vmul.f32 %v679_v35, %v1341_v31  ;;  %v339_v31 = vsel %vm303_vm1, %v1152_v42, %v265_v9  ;;  %v558_v35 = vsel %vm522_vm2, %v1252_v5, %v484_v32  ;;  %vm305_vm1 = vcmp.eq.s32.totalorder %v1870_v1, %v1138_v38 }
  0x83   :  { %v413_v15 = vsel %vm377_vm6, %v1187_v51, %v339_v31  ;;  %vm599_vm2 = vcmp.eq.s32.totalorder %v1788_v46, %v1257_v6  ;;  %vm524_vm6 = vcmp.eq.s32.totalorder %v1829_v2, %v1215_v59 }
  0x84   :  { %v487_v9 = vsel %vm451_vm10, %v1210_v58, %v413_v15  ;;  %v486_v15 = vsel %vm450_vm4, %v1210_v58, %v412_v44  ;;  %vm598_vm10 = vcmp.eq.s32.totalorder %v1829_v2, %v1257_v6  ;;  %vm600_vm4 = vcmp.eq.s32.totalorder %v1899_v27, %v1257_v6 }
  0x85   :  { %v694_v14 = vpop.permute.xlu1 %693  ;;  %v684_v13 = vpop.permute.xlu0 %683  ;;  %v560_v46 = vsel %vm524_vm6, %v1252_v5, %v486_v15 }
  0x86   :  { %v837_v41 = vmul.f32 %v684_v13, %v1414_v57  ;;  %v838_v57 = vmul.f32 %v689_v56, %v1312_v21  ;;  %v839_v21 = vmul.f32 %v694_v14, %v1365_v39  ;;  %v1931_v56 = vsel %vm597_vm3, %v1293_v12, %v559_v61 }
  0x87   :  { %v118_v14 = vsel %vm82_vm13, %v1082_v24, 0.0  ;;  %v1967_v61 = vadd.s32 216, %v1052_v16  ;;  %vm230_vm3 = vcmp.eq.s32.totalorder %v1899_v27, %v1110_v30  ;;  %vm378_vm13 = vcmp.eq.s32.totalorder %v1899_v27, %v1157_v43 }
  0x88   :  { %v868_v34 = vadd.f32 %v837_v41, %v836_v18  ;;  %v1961_v18 = vsel %vm596_vm9, %v1293_v12, %v558_v35  ;;  %v267_v41 = vsel %vm231_vm15, %v1133_v37, %v193_v54  ;;  %v192_v31 = vsel %vm156_vm7, %v1105_v29, %v118_v14  ;;  %v2027_v14 = vld [vmem:[%s2347_s0] ss:$0 sm:$0xff] }
  0x89   :  { %v704_v3 = vpop.permute.xlu1 %703  ;;  %v699_v49 = vpop.permute.xlu0 %698  ;;  %v266_v53 = vsel %vm230_vm3, %v1133_v37, %v192_v31  ;;  %vm85_vm9 = vcmp.eq.s32.totalorder %v1967_v61, %v1066_v20  ;;  %vm159_vm15 = vcmp.eq.s32.totalorder %v1967_v61, %v1087_v25  ;;  %vm601_vm7 = vcmp.eq.s32.totalorder %v1870_v1, %v1257_v6  ;;  %v2177_v6 = vld [vmem:[%s2348_s1 + $0x5] ss:$0 sm:$0xff] }
  0x8a   :  { %v869_v55 = vadd.f32 %v868_v34, %v838_v57  ;;  %v840_v39 = vmul.f32 %v699_v49, %v1487_v28  ;;  %v841_v28 = vmul.f32 %v704_v3, %v1452_v10  ;;  %v561_v34 = vsel %vm525_vm0, %v1252_v5, %v487_v9 }
  0x8b   :  { %v341_v49 = vsel %vm305_vm1, %v1152_v42, %v267_v41  ;;  %v340_v20 = vsel %vm304_vm8, %v1152_v42, %v266_v53  ;;  %vm526_vm1 = vcmp.eq.s32.totalorder %v1899_v27, %v1215_v59  ;;  %vm233_vm3 = vcmp.eq.s32.totalorder %v1967_v61, %v1110_v30  ;;  %v2088_v53 = vld [vmem:[%s2347_s0 + $0x2] ss:$0 sm:$0xff] }
  0x8c   :  { %v870_v50 = vadd.f32 %v869_v55, %v839_v21  ;;  %v1992_v21 = vadd.s32 208, %v1052_v16  ;;  %vm381_vm8 = vcmp.eq.s32.totalorder %v1967_v61, %v1157_v43  ;;  %v2115_v59 = vld [vmem:[%s2348_s1 + $0x2] ss:$0 sm:$0xff]  ;;  %v2152_v43 = vld [vmem:[%s2347_s0 + $0x4] ss:$0 sm:$0xff] }
  0x8d   :  { %v714_v22 = vpop.permute.xlu1 %713  ;;  %v709_v26 = vpop.permute.xlu0 %708 }
  0x8e   :  { %v871_v13 = vadd.f32 %v870_v50, %v840_v39  ;;  %v842_v10 = vmul.f32 %v709_v26, %v1525_v47  ;;  %v843_v47 = vmul.f32 %v714_v22, %v1502_v36  ;;  %v2002_v39 = vsel %vm599_vm2, %v1293_v12, %v561_v34 }
  0x8f   :  { %v415_v50 = vsel %vm379_vm5, %v1187_v51, %v341_v49  ;;  %v121_v22 = vsel %vm85_vm9, %v1082_v24, 0.0  ;;  %vm84_vm0 = vcmp.eq.s32.totalorder %v1992_v21, %v2027_v14  ;;  %v414_v24 = vsel %vm378_vm13, %v1187_v51, %v340_v20  ;;  %v2082_v49 = vld [vmem:[%s2348_s1 + $0x1] ss:$0 sm:$0xff] }
  0x90   :  { %v872_v32 = vadd.f32 %v871_v13, %v841_v28  ;;  %v489_v9 = vsel %vm453_vm12, %v1210_v58, %v415_v50  ;;  %v195_v17 = vsel %vm159_vm15, %v1105_v29, %v121_v22  ;;  %v2060_v29 = vadd.s32 232, %v1052_v16  ;;  %v2146_v22 = vld [vmem:[%s2348_s1 + $0x3] ss:$0 sm:$0xff] }
  0x91   :  { %v724_v57 = vpop.permute.xlu1 %723  ;;  %v719_v23 = vpop.permute.xlu0 %718  ;;  %v563_v41 = vsel %vm527_vm14, %v1252_v5, %v489_v9  ;;  %vm307_vm5 = vcmp.eq.s32.totalorder %v1967_v61, %v1138_v38  ;;  %vm232_vm6 = vcmp.eq.s32.totalorder %v1992_v21, %v2088_v53  ;;  %vm455_vm12 = vcmp.eq.s32.totalorder %v1967_v61, %v1176_v48 }
  0x92   :  { %v873_v3 = vadd.f32 %v872_v32, %v842_v10  ;;  %v844_v55 = vmul.f32 %v719_v23, %v1579_v8  ;;  %v845_v8 = vmul.f32 %v724_v57, %v1553_v62  ;;  %v2049_v10 = vld [vmem:[%s2348_s1] ss:$0 sm:$0xff]  ;;  %v488_v57 = vsel %vm452_vm11, %v1210_v58, %v414_v24  ;;  %v2192_v24 = vld [vmem:[%s2347_s0 + $0x5] ss:$0 sm:$0xff] }
  0x93   :  { %v120_v32 = vsel %vm84_vm0, %v2049_v10, 0.0  ;;  %v2065_v23 = vadd.s32 224, %v1052_v16  ;;  %v562_v38 = vsel %vm526_vm1, %v1252_v5, %v488_v57  ;;  %vm87_vm9 = vcmp.eq.s32.totalorder %v2060_v29, %v2027_v14 }
  0x94   :  { %v874_v36 = vadd.f32 %v873_v3, %v843_v47  ;;  %v2071_v47 = vsel %vm598_vm10, %v1293_v12, %v560_v46  ;;  %v269_v3 = vsel %vm233_vm3, %v1133_v37, %v195_v17  ;;  %v2096_v37 = vsel %vm601_vm7, %v1293_v12, %v563_v41 }
  0x95   :  { %v734_v35 = vpop.permute.xlu1 %733  ;;  %v729_v0 = vpop.permute.xlu0 %728  ;;  %vm86_vm10 = vcmp.eq.s32.totalorder %v2065_v23, %v2027_v14  ;;  %v123_v50 = vsel %vm87_vm9, %v2049_v10, 0.0  ;;  %v2140_v20 = vadd.s32 248, %v1052_v16  ;;  %vm380_vm0 = vcmp.eq.s32.totalorder %v1992_v21, %v2152_v43 }
  0x96   :  { %v875_v54 = vadd.f32 %v874_v36, %v844_v55  ;;  %v846_v62 = vmul.f32 %v729_v0, %v1690_v52  ;;  %v847_v25 = vmul.f32 %v734_v35, %v1673_v7  ;;  %v2055_v7 = vld [vmem:[%s2347_s0 + $0x1] ss:$0 sm:$0xff]  ;;  %v343_v36 = vsel %vm307_vm5, %v1152_v42, %v269_v3 }
  0x97   :  { %vm158_vm2 = vcmp.eq.s32.totalorder %v1992_v21, %v2055_v7  ;;  %v2126_v42 = vadd.s32 240, %v1052_v16  ;;  %vm161_vm14 = vcmp.eq.s32.totalorder %v2060_v29, %v2055_v7  ;;  %vm160_vm15 = vcmp.eq.s32.totalorder %v2065_v23, %v2055_v7 }
  0x98   :  { %v876_v26 = vadd.f32 %v875_v54, %v845_v8  ;;  %v194_v2 = vsel %vm158_vm2, %v2082_v49, %v120_v32  ;;  %v417_v8 = vsel %vm381_vm8, %v1187_v51, %v343_v36  ;;  %v122_v54 = vsel %vm86_vm10, %v2049_v10, 0.0  ;;  %v957_v36 = vld [vmem:[%s2348_s1 + $0x6] ss:$0 sm:$0xff] }
  0x99   :  { %v744_v28 = vpop.permute.xlu1 %743  ;;  %v739_v13 = vpop.permute.xlu0 %738  ;;  %v268_v5 = vsel %vm232_vm6, %v2115_v59, %v194_v2  ;;  %vm235_vm7 = vcmp.eq.s32.totalorder %v2060_v29, %v2088_v53  ;;  %vm88_vm11 = vcmp.eq.s32.totalorder %v2126_v42, %v2027_v14  ;;  %vm234_vm1 = vcmp.eq.s32.totalorder %v2065_v23, %v2088_v53 }
  0x9a   :  { %v877_v52 = vadd.f32 %v876_v26, %v846_v62  ;;  %v848_v30 = vmul.f32 %v739_v13, %v1696_v11  ;;  %v849_v58 = vmul.f32 %v744_v28, %v1693_v33  ;;  %v197_v26 = vsel %vm161_vm14, %v2082_v49, %v123_v50 }
  0x9b   :  { %v196_v13 = vsel %vm160_vm15, %v2082_v49, %v122_v54  ;;  %vm454_vm3 = vcmp.eq.s32.totalorder %v1992_v21, %v2192_v24  ;;  %vm89_vm2 = vcmp.eq.s32.totalorder %v2140_v20, %v2027_v14  ;;  %v124_v17 = vsel %vm88_vm11, %v2049_v10, 0.0  ;;  %v958_v54 = vld [vmem:[%s2348_s1 + $0x7] ss:$0 sm:$0xff] }
  0x9c   :  { %v878_v31 = vadd.f32 %v877_v52, %v847_v25  ;;  %v2202_v52 = vld [vmem:[%s2347_s0 + $0x6] ss:$0 sm:$0xff]  ;;  %vm162_vm5 = vcmp.eq.s32.totalorder %v2126_v42, %v2055_v7  ;;  %v125_v57 = vsel %vm89_vm2, %v2049_v10, 0.0  ;;  %vm163_vm9 = vcmp.eq.s32.totalorder %v2140_v20, %v2055_v7  ;;  %v2241_v10 = vld [vmem:[%s2347_s0 + $0x7] ss:$0 sm:$0xff] }
  0x9d   :  { %v754_v34 = vpop.permute.xlu1 %753  ;;  %v749_v44 = vpop.permute.xlu0 %748  ;;  %vm528_vm10 = vcmp.eq.s32.totalorder %v1992_v21, %v2202_v52  ;;  %vm382_vm14 = vcmp.eq.s32.totalorder %v2065_v23, %v2152_v43  ;;  %vm383_vm15 = vcmp.eq.s32.totalorder %v2060_v29, %v2152_v43  ;;  %v199_v2 = vsel %vm163_vm9, %v2082_v49, %v125_v57 }
  0x9e   :  { %v879_v11 = vadd.f32 %v878_v31, %v848_v30  ;;  %v850_v33 = vmul.f32 %v749_v44, %v1770_v60  ;;  %v2121_v60 = vld [vmem:[%s2347_s0 + $0x3] ss:$0 sm:$0xff]  ;;  %v851_v35 = vmul.f32 %v754_v34, %v1721_v19  ;;  %v270_v30 = vsel %vm234_vm1, %v2115_v59, %v196_v13 }
  0x9f   :  { %vm306_vm13 = vcmp.eq.s32.totalorder %v1992_v21, %v2121_v60  ;;  %vm309_vm6 = vcmp.eq.s32.totalorder %v2060_v29, %v2121_v60  ;;  %vm308_vm8 = vcmp.eq.s32.totalorder %v2065_v23, %v2121_v60  ;;  %v198_v44 = vsel %vm162_vm5, %v2082_v49, %v124_v17 }
  0xa0   :  { %v880_v55 = vadd.f32 %v879_v11, %v849_v58  ;;  %v342_v62 = vsel %vm306_vm13, %v2146_v22, %v268_v5  ;;  %vm603_vm13 = vcmp.eq.s32.totalorder %v1967_v61, %v2241_v10  ;;  %v344_v7 = vsel %vm308_vm8, %v2146_v22, %v270_v30 }
  0xa1   :  { %v764_v1 = vpop.permute.xlu1 %763  ;;  %v759_v15 = vpop.permute.xlu0 %758  ;;  %vm602_vm11 = vcmp.eq.s32.totalorder %v1992_v21, %v2241_v10  ;;  %vm456_vm1 = vcmp.eq.s32.totalorder %v2065_v23, %v2192_v24  ;;  %vm457_vm2 = vcmp.eq.s32.totalorder %v2060_v29, %v2192_v24  ;;  %vm384_vm5 = vcmp.eq.s32.totalorder %v2126_v42, %v2152_v43 }
  0xa2   :  { %v881_v0 = vadd.f32 %v880_v55, %v850_v33  ;;  %v852_v19 = vmul.f32 %v759_v15, %v1865_v63  ;;  %v2160_v63 = vsel %vm600_vm4, %v1293_v12, %v562_v38  ;;  %v853_v9 = vmul.f32 %v764_v1, %v1862_v40  ;;  %v2186_v40 = vld [vmem:[%s2348_s1 + $0x4] ss:$0 sm:$0xff] }
  0xa3   :  { %v491_v12 = vsel %vm455_vm12, %v2177_v6, %v417_v8  ;;  %v416_v27 = vsel %vm380_vm0, %v2186_v40, %v342_v62  ;;  %vm529_vm4 = vcmp.eq.s32.totalorder %v1967_v61, %v2202_v52  ;;  %vm236_vm12 = vcmp.eq.s32.totalorder %v2126_v42, %v2088_v53 }
  0xa4   :  { %v882_v46 = vadd.f32 %v881_v0, %v851_v35  ;;  %v490_v34 = vsel %vm454_vm3, %v2177_v6, %v416_v27  ;;  %vm237_vm0 = vcmp.eq.s32.totalorder %v2140_v20, %v2088_v53  ;;  %v272_v55 = vsel %vm236_vm12, %v2115_v59, %v198_v44 }
  0xa5   :  { %v774_v16 = vpop.permute.xlu1 %773  ;;  %v769_v51 = vpop.permute.xlu0 %768  ;;  %v564_v1 = vsel %vm528_vm10, %v957_v36, %v490_v34  ;;  %v418_v49 = vsel %vm382_vm14, %v2186_v40, %v344_v7  ;;  %v273_v15 = vsel %vm237_vm0, %v2115_v59, %v199_v2  ;;  %vm311_vm3 = vcmp.eq.s32.totalorder %v2140_v20, %v2121_v60 }
  0xa6   :  { %v883_v28 = vadd.f32 %v882_v46, %v852_v19  ;;  %v854_v48 = vmul.f32 %v769_v51, %v1876_v4  ;;  %v271_v4 = vsel %vm235_vm7, %v2115_v59, %v197_v26  ;;  %v855_v14 = vmul.f32 %v774_v16, %v1873_v45 }
  0xa7   :  { %vm310_vm7 = vcmp.eq.s32.totalorder %v2126_v42, %v2121_v60  ;;  %v492_v60 = vsel %vm456_vm1, %v2177_v6, %v418_v49  ;;  %v565_v8 = vsel %vm529_vm4, %v957_v36, %v491_v12  ;;  %v638_v19 = vsel %vm602_vm11, %v958_v54, %v564_v1 }
  0xa8   :  { %v884_v25 = vadd.f32 %v883_v28, %v853_v9  ;;  %v346_v50 = vsel %vm310_vm7, %v2146_v22, %v272_v55  ;;  %vm385_vm8 = vcmp.eq.s32.totalorder %v2140_v20, %v2152_v43  ;;  %vm458_vm4 = vcmp.eq.s32.totalorder %v2126_v42, %v2192_v24 }
  0xa9   :  { %v784_v41 = vpop.permute.xlu1 %783  ;;  %v779_v32 = vpop.permute.xlu0 %778  ;;  %v420_v16 = vsel %vm384_vm5, %v2186_v40, %v346_v50  ;;  %vm531_vm9 = vcmp.eq.s32.totalorder %v2060_v29, %v2202_v52  ;;  %vm604_vm10 = vcmp.eq.s32.totalorder %v2065_v23, %v2241_v10  ;;  %vm459_vm12 = vcmp.eq.s32.totalorder %v2140_v20, %v2192_v24 }
  0xaa   :  { %v885_v31 = vadd.f32 %v884_v25, %v854_v48  ;;  %v856_v45 = vmul.f32 %v779_v32, %v1961_v18  ;;  %v345_v18 = vsel %vm309_vm6, %v2146_v22, %v271_v4  ;;  %v857_v38 = vmul.f32 %v784_v41, %v1931_v56 }
  0xab   :  { %v419_v0 = vsel %vm383_vm15, %v2186_v40, %v345_v18  ;;  %vm530_vm6 = vcmp.eq.s32.totalorder %v2065_v23, %v2202_v52  ;;  %v639_v28 = vsel %vm603_vm13, %v958_v54, %v565_v8  ;;  %v494_v13 = vsel %vm458_vm4, %v2177_v6, %v420_v16 }
  0xac   :  { %v886_v3 = vadd.f32 %v885_v31, %v855_v14  ;;  %v493_v21 = vsel %vm457_vm2, %v2177_v6, %v419_v0  ;;  %vm532_vm14 = vcmp.eq.s32.totalorder %v2126_v42, %v2202_v52  ;;  %vm605_vm15 = vcmp.eq.s32.totalorder %v2060_v29, %v2241_v10 }
  0xad   :  { %v794_v58 = vpop.permute.xlu1 %793  ;;  %v789_v11 = vpop.permute.xlu0 %788  ;;  %v567_v23 = vsel %vm531_vm9, %v957_v36, %v493_v21  ;;  %vm533_vm0 = vcmp.eq.s32.totalorder %v2140_v20, %v2202_v52  ;;  %v568_v17 = vsel %vm532_vm14, %v957_v36, %v494_v13  ;;  %vm606_vm13 = vcmp.eq.s32.totalorder %v2126_v42, %v2241_v10 }
  0xae   :  { %v887_v33 = vadd.f32 %v886_v3, %v856_v45  ;;  %v858_v56 = vmul.f32 %v789_v11, %v2071_v47  ;;  %v859_v47 = vmul.f32 %v794_v58, %v2002_v39  ;;  %v347_v39 = vsel %vm311_vm3, %v2146_v22, %v273_v15 }
  0xaf   :  { %v566_v22 = vsel %vm530_vm6, %v957_v36, %v492_v60  ;;  %v421_v9 = vsel %vm385_vm8, %v2186_v40, %v347_v39  ;;  %v641_v41 = vsel %vm605_vm15, %v958_v54, %v567_v23  ;;  %vm607_vm7 = vcmp.eq.s32.totalorder %v2140_v20, %v2241_v10 }
  0xb0   :  { %v888_v53 = vadd.f32 %v887_v33, %v857_v38  ;;  %v640_v48 = vsel %vm604_vm10, %v958_v54, %v566_v22  ;;  %v495_v24 = vsel %vm459_vm12, %v2177_v6, %v421_v9  ;;  %v642_v14 = vsel %vm606_vm13, %v958_v54, %v568_v17 }
  0xb1   :  { %v804_v5 = vpop.permute.xlu1 %803  ;;  %v799_v35 = vpop.permute.xlu0 %798  ;;  %v569_v30 = vsel %vm533_vm0, %v957_v36, %v495_v24  ;;  %v906_v20 = vstv %s2350_s3 }
  0xb2   :  { %v889_v59 = vadd.f32 %v888_v53, %v858_v56  ;;  %v860_v46 = vmul.f32 %v799_v35, %v2160_v63  ;;  %v861_v43 = vmul.f32 %v804_v5, %v2096_v37  ;;  %v643_v34 = vsel %vm607_vm7, %v958_v54, %v569_v30 }
  0xb4   :  { %v890_v62 = vadd.f32 %v889_v59, %v859_v47 }
  0xb5   :  { %v814_v51 = vpop.permute.xlu1 %813  ;;  %v809_v26 = vpop.permute.xlu0 %808 }
  0xb6   :  { %v891_v63 = vadd.f32 %v890_v62, %v860_v46  ;;  %v862_v12 = vmul.f32 %v809_v26, %v638_v19  ;;  %v863_v61 = vmul.f32 %v814_v51, %v639_v28 }
  0xb8   :  { %v892_v27 = vadd.f32 %v891_v63, %v861_v43 }
  0xb9   :  { %v824_v37 = vpop.permute.xlu1 %823  ;;  %v819_v40 = vpop.permute.xlu0 %818 }
  0xba   :  { %v893_v25 = vadd.f32 %v892_v27, %v862_v12  ;;  %v864_v32 = vmul.f32 %v819_v40, %v640_v48  ;;  %v865_v31 = vmul.f32 %v824_v37, %v641_v41 }
  0xbc   :  { %v894_v4 = vadd.f32 %v893_v25, %v863_v61 }
  0xbd   :  { %v829_v29 = vpop.permute.xlu0 %828  ;;  %v834_v57 = vpop.permute.xlu1 %833 }
  0xbe   :  { %v895_v6 = vadd.f32 %v894_v4, %v864_v32  ;;  %v866_v52 = vmul.f32 %v829_v29, %v642_v14  ;;  %v867_v45 = vmul.f32 %v834_v57, %v643_v34 }
  0xc0   :  { %v896_v44 = vadd.f32 %v895_v6, %v865_v31 }
  0xc2   :  { %v897_v3 = vadd.f32 %v896_v44, %v866_v52 }
  0xc4   :  { %v898_v7 = vadd.f32 %v897_v3, %v867_v45 }
  0xc6   :  { %v899_v58 = vrot.slane %v898_v7, 4 }
  0xc8   :  { %v900_v42 = vadd.f32 %v899_v58, %v898_v7 }
  0xca   :  { %v901_v11 = vrot.slane %v900_v42, 2 }
  0xcc   :  { %v902_v18 = vadd.f32 %v901_v11, %v900_v42 }
  0xce   :  { %v903_v2 = vrot.slane %v902_v18, 1 }
  0xd0   :  { %v904_v10 = vadd.f32 %v903_v2, %v902_v18 }
  0xd2   :  { %v907_v38 = vadd.f32 %v906_v20, %v904_v10 }
  0xd4   :  { %908 = vst [vmem:[#allocation3] sm:$0x1] %v907_v38 }
  0xd5   :  { %970 = shalt.err (!%p967_p4)
}
  0xd6   :  { %s971_s17 = scalar_lea.hbm %s2351_s4, 16 }
  0xd7   :  { %p972_p5 = scmp.ne.s32.totalorder %s2351_s4, %s971_s17  ;;  %p975_p6 = scmp.lt.u32.totalorder %s971_s17, %s2351_s4 }
  0xd9   :  { %p977_p7 = pnand %p975_p6, %p972_p5 }
  0xdb   :  { %980 = shalt.err (!%p977_p7)
}
  0xdc   :  { %918 = dma.vmem_to_hbm [thread:$0]  %s916_s12, 16, %s2351_s4, [#allocation4]  }
  0xdd   :  { %981 = dma.done.wait [#allocation4], 16  }
  0xde   :  { %982 = vsyncadd [#allocation4], 4294967280 }
  0xdf   :  { %922 = vsyncpa [#allocation4], 1 }

</bundles_post_ra>
